<compile_context>
chip_gen: v7x
topology: tpu7x:2x2x1
jax: 0.10.0
libtpu: 0.0.40
codegen_flags: <defaults>
</compile_context>

<pallas_src>
import jax
import jax.numpy as jnp
from jax.experimental import pallas as pl
from jax.experimental.pallas import tpu as pltpu


def _conv_as_matmul_kernel(p_ref, w_ref, b_ref, o_ref):
    # p_ref: (1, Kp, HW)   im2col patches for one batch element (lane-dense HW)
    # w_ref: (Cout, Kp)    conv weights reshaped for the matmul (grid-resident)
    # b_ref: (Cout, 1)     bias, broadcast over HW
    # o_ref: (1, Cout, HW) output in NCHW-flattened order
    acc = jnp.dot(w_ref[...], p_ref[0], preferred_element_type=jnp.float32)
    o_ref[0] = (acc + b_ref[...]).astype(o_ref.dtype)


def dummy_encoder_forward(x_nchw, w_oihw, bias):
    """Conv2d(3, Cout, k=3, padding=1), matching PyTorch NCHW semantics."""
    N, Cin, H, W = x_nchw.shape
    Cout = w_oihw.shape[0]
    HW = H * W
    K = Cin * 9
    Kp = 32  # pad K=27 -> 32 (sublane-aligned); extra zeros don't change the dot

    # ---- wrapper-side layout glue (done once by XLA, outside the kernel) ----
    # same-padding + im2col: (N, K, H*W), K ordered as (kh, kw, cin)
    x_pad = jnp.pad(x_nchw, ((0, 0), (0, 0), (1, 1), (1, 1)))
    patches = jnp.stack(
        [x_pad[:, :, kh:kh + H, kw:kw + W] for kh in range(3) for kw in range(3)],
        axis=1)                                        # (N, 9, Cin, H, W)
    patches = patches.reshape(N, K, HW)
    patches = jnp.pad(patches, ((0, 0), (0, Kp - K), (0, 0)))   # (N, Kp, HW)

    # OIHW -> (Cout, kh, kw, cin) -> (Cout, K) -> (Cout, Kp); matches patch K order
    w2d = jnp.transpose(w_oihw, (0, 2, 3, 1)).reshape(Cout, K)
    w2d = jnp.pad(w2d, ((0, 0), (0, Kp - K)))
    b2d = bias.reshape(Cout, 1)

    out = pl.pallas_call(
        _conv_as_matmul_kernel,
        out_shape=jax.ShapeDtypeStruct((N, Cout, HW), x_nchw.dtype),
        grid_spec=pltpu.PrefetchScalarGridSpec(
            num_scalar_prefetch=0,
            grid=(N,),
            in_specs=[
                pl.BlockSpec((1, Kp, HW), lambda n: (n, 0, 0)),
                pl.BlockSpec((Cout, Kp), lambda n: (0, 0)),   # resident weights
                pl.BlockSpec((Cout, 1), lambda n: (0, 0)),    # resident bias
            ],
            out_specs=pl.BlockSpec((1, Cout, HW), lambda n: (n, 0, 0)),
        ),
        compiler_params=pltpu.CompilerParams(
            dimension_semantics=("parallel",)),
    )(patches, w2d, b2d)

    # (N, Cout, H*W) -> (N, Cout, H, W): already NCHW; no transpose needed.
    return out.reshape(N, Cout, H, W)


if __name__ == "__main__":
    key = jax.random.PRNGKey(0)
    k_x, k_w, k_b = jax.random.split(key, 3)

    N, Cin, H, W = 2, 3, 16, 16
    Cout = 64

    x = jax.random.normal(k_x, (N, Cin, H, W), dtype=jnp.float32)

    # Deterministic parameter init (PyTorch-style uniform bound 1/sqrt(fan_in)).
    fan_in = Cin * 3 * 3
    bound = 1.0 / (fan_in ** 0.5)
    w = jax.random.uniform(k_w, (Cout, Cin, 3, 3), jnp.float32, -bound, bound)
    b = jax.random.uniform(k_b, (Cout,), jnp.float32, -bound, bound)

    out = jax.block_until_ready(dummy_encoder_forward(x, w, b))

    # Sanity check against XLA's conv (same semantics as nn.Conv2d).
    ref = jax.lax.conv_general_dilated(
        x, w, window_strides=(1, 1), padding=((1, 1), (1, 1)),
        dimension_numbers=("NCHW", "OIHW", "NCHW"),
    ) + b.reshape(1, Cout, 1, 1)
    assert out.shape == (N, Cout, H, W)
    assert jnp.allclose(out, ref, atol=1e-4, rtol=1e-4)

    print("KERNEL_OK")
</pallas_src>

<mosaic_0001>
module attributes {stable_mosaic.version = 11 : i64} {
  func.func @_conv_as_matmul_kernel(%arg0: i32, %arg1: memref<1x32x256xf32, #tpu.memory_space<vmem>>, %arg2: memref<64x32xf32, #tpu.memory_space<vmem>>, %arg3: memref<64x1xf32, #tpu.memory_space<vmem>>, %arg4: memref<1x64x256xf32, #tpu.memory_space<vmem>>) attributes {dimension_semantics = [#tpu.dimension_semantics<parallel>], iteration_bounds = array<i64: 2>, scalar_prefetch = 0 : i64, scratch_operands = 0 : i64, tpu.core_type = #tpu.core_type<tc>, window_params = [{transform_indices = @transform_0, window_bounds = array<i64: 1, 32, 256>}, {pipeline_mode = #tpu.pipeline_mode<synchronous>, transform_indices = @transform_1, window_bounds = array<i64: 64, 32>}, {pipeline_mode = #tpu.pipeline_mode<synchronous>, transform_indices = @transform_2, window_bounds = array<i64: 64, 1>}, {transform_indices = @transform_3, window_bounds = array<i64: 1, 64, 256>}]} {
    %c0 = arith.constant 0 : index
    %c0_0 = arith.constant 0 : index
    %0 = vector.load %arg2[%c0, %c0_0] : memref<64x32xf32, #tpu.memory_space<vmem>>, vector<64x32xf32>
    %c0_1 = arith.constant 0 : index
    %c0_2 = arith.constant 0 : index
    %c0_3 = arith.constant 0 : index
    %1 = vector.load %arg1[%c0_1, %c0_2, %c0_3] : memref<1x32x256xf32, #tpu.memory_space<vmem>>, vector<1x32x256xf32>
    %2 = vector.shape_cast %1 : vector<1x32x256xf32> to vector<32x256xf32>
    %cst = arith.constant dense<0.000000e+00> : vector<64x256xf32>
    %3 = tpu.matmul %0, %2, %cst {dimension_numbers = #tpu.dot_dimension_numbers<[1], [0], [0], [1], [0, 0, 1, 1], [], []>} : vector<64x32xf32>, vector<32x256xf32>, vector<64x256xf32> -> vector<64x256xf32>
    %c0_4 = arith.constant 0 : index
    %c0_5 = arith.constant 0 : index
    %4 = vector.load %arg3[%c0_4, %c0_5] : memref<64x1xf32, #tpu.memory_space<vmem>>, vector<64x1xf32>
    %5 = vector.broadcast %4 : vector<64x1xf32> to vector<64x256xf32>
    %6 = arith.addf %3, %5 : vector<64x256xf32>
    %c0_6 = arith.constant 0 : index
    %c0_7 = arith.constant 0 : index
    %c0_8 = arith.constant 0 : index
    %7 = vector.load %arg4[%c0_6, %c0_7, %c0_8] : memref<1x64x256xf32, #tpu.memory_space<vmem>>, vector<1x64x256xf32>
    %8 = vector.shape_cast %7 : vector<1x64x256xf32> to vector<64x256xf32>
    %9 = vector.shape_cast %6 : vector<64x256xf32> to vector<1x64x256xf32>
    tpu.vector_store %arg4[%c0_6, %c0_7, %c0_8], %9 {strides = array<i32>} : memref<1x64x256xf32, #tpu.memory_space<vmem>>, vector<1x64x256xf32>,
    return
  }
  func.func @transform_0(%arg0: i32) -> (i32, i32, i32) {
    %c0_i32 = arith.constant 0 : i32
    %c0_i32_0 = arith.constant 0 : i32
    %c0_i32_1 = arith.constant 0 : i32
    return %arg0, %c0_i32, %c0_i32_0 : i32, i32, i32
  }
  func.func @transform_1(%arg0: i32) -> (i32, i32) {
    %c0_i32 = arith.constant 0 : i32
    %c0_i32_0 = arith.constant 0 : i32
    %c0_i32_1 = arith.constant 0 : i32
    return %c0_i32, %c0_i32_0 : i32, i32
  }
  func.func @transform_2(%arg0: i32) -> (i32, i32) {
    %c0_i32 = arith.constant 0 : i32
    %c0_i32_0 = arith.constant 0 : i32
    %c0_i32_1 = arith.constant 0 : i32
    return %c0_i32, %c0_i32_0 : i32, i32
  }
  func.func @transform_3(%arg0: i32) -> (i32, i32, i32) {
    %c0_i32 = arith.constant 0 : i32
    %c0_i32_0 = arith.constant 0 : i32
    %c0_i32_1 = arith.constant 0 : i32
    return %arg0, %c0_i32, %c0_i32_0 : i32, i32, i32
  }
}

</mosaic_0001>

<bundles_post_ra>
// kernel: tpu_custom_call.1
= control target key start
LH: loop header
LB: loop body
LE: loop exit
PB: predicated region body
PF: predicated region fallthrough
CT: control target
= control target key end

     0   :  { %8 = vsyncpa [#allocation3], 0  ;;  %s813_s0 = inlined_call_operand.vmem [shape: f32[2,32,256], index: 0, kind: input, shape index: {}]   ;;  %s814_s1 = inlined_call_operand.vmem [shape: f32[64,32], index: 1, kind: input, shape index: {}]   ;;  %s815_s2 = inlined_call_operand.vmem [shape: f32[64,1], index: 2, kind: input, shape index: {}]   ;;  %s816_s3 = inlined_call_operand.hbm [shape: f32[2,64,256], index: 3, kind: output, shape index: {}]  }
   0x1   :  { %10 = vsyncpa [#allocation3 + $0x1], 0  ;;  %s631_s12 = smov 0   ;;  %s633_s13 = smov 0  }
   0x2   :  { %s635_s14 = smov 0   ;;  %s637_s15 = smov 0  }
   0x3 LB: > { %s652_s16 = sadd.s32 4294967295, %s604_s15   ;;  %s463_s17 = sadd.s32 4294967294, %s604_s15   ;;  %s604_s15 = sphi %s637_s15, %s822_s15   ;;  %s600_s14 = sphi %s635_s14, %s821_s14   ;;  %s596_s13 = sphi %s633_s13, %s820_s13   ;;  %s592_s12 = sphi %s631_s12, %s819_s12  }
   0x4   : > { %s656_s18 = sadd.s32 1, %s604_s15   ;;  %s91_s19 = sadd.s32 1, %s600_s14 }
   0x5   : > { %s88_s20 = ssub.s32 %s604_s15, %s656_s18  ;;  %p101_p0 = scmp.ne.s32.totalorder %s600_s14, %s596_s13 }
   0x6   : > { %p89_p1 = scmp.eq.s32.totalorder %s88_s20, 0  ;;  %p102_p2 = scmp.eq.s32.totalorder %s652_s16, 1 }
   0x7   : > { %p107_p3 = scmp.ne.s32.totalorder %s596_s13, %s592_s12  ;;  %p108_p4 = scmp.eq.s32.totalorder %s463_s17, 1 }
   0x8   : > { %s667_s21 = scalar_select %p89_p1, %s600_s14, %s91_s19  }
   0x9   : > { %p669_p5 = por %p102_p2, %p101_p0  ;;  %p673_p6 = por %p108_p4, %p107_p3 }
   0xa   : > { %p466_p7 = scmp.ge.s32.totalorder %s604_s15, 1  ;;  %p140_p8 = scmp.lt.s32.totalorder %s604_s15, 3 }
   0xc   : > { %p141_p9 = pnand %p466_p7, %p140_p8 }
   0xd   : > { %p164_p10 = scmp.lt.s32.totalorder (!%p141_p9), %s652_s16, 1  ;;  %v606_v0 = vmov (!%p141_p9), 0.0   ;;  %v607_v1 = vmov (!%p141_p9), 0   ;;  %v187_v2 = vld [vmem:[%s815_s2 + $0x10] sm:$0xff] (!%p141_p9)  ;;  %v185_v3 = vld [vmem:[%s815_s2] sm:$0xff] (!%p141_p9)  ;;  %v188_v4 = vld [vmem:[%s815_s2 + $0x18] sm:$0xff] (!%p141_p9) }
   0xe   : > { %144 = sbr.rel (%p141_p9) target bundleno = 278 (0x116), region = 32  ;;  %322 = vmatprep.mubr.f32.mxu0 (!%p141_p9), %v606_v0  ;;  %346 = vmatprep.mubr.f32.mxu1 (!%p141_p9), %v606_v0  ;;  %v186_v5 = vld [vmem:[%s815_s2 + $0x8] sm:$0xff] (!%p141_p9)  ;;  %v189_v18 = vld [vmem:[%s815_s2 + $0x20] sm:$0xff] (!%p141_p9)  ;;  %v192_v20 = vld [vmem:[%s815_s2 + $0x38] sm:$0xff] (!%p141_p9)  ;;  %vm233_vm0 = vcmask (!%p141_p9), 261120   ;;  %s161_s25 = sand.u32 (!%p141_p9), 1, %s596_s13  }
   0xf   : > { %541 = vset.pattern.permute.xlu1 (!%p141_p9), %v607_v1  ;;  %540 = vset.pattern.permute.xlu0 (!%p141_p9), %v607_v1  ;;  %v190_v17 = vld [vmem:[%s815_s2 + $0x28] sm:$0xff] (!%p141_p9)  ;;  %v191_v21 = vld [vmem:[%s815_s2 + $0x30] sm:$0xff] (!%p141_p9)  ;;  %v169_v22 = vld [vmem:[%s814_s1] sm:$0xff] (!%p141_p9)  ;;  %s467_s26 = sshll.u32 (!%p141_p9), %s161_s25, 7  ;;  %s484_s28 = sshll.u32 (!%p141_p9), %s652_s16, 11 }
  0x10   : > { %205 = vperm.xlu1 (!%p141_p9), %541, %v187_v2   ;;  %195 = vperm.xlu0 (!%p141_p9), %540, %v185_v3   ;;  %v173_v23 = vld [vmem:[%s814_s1 + $0x20] sm:$0xff] (!%p141_p9)  ;;  %v170_v24 = vld [vmem:[%s814_s1 + $0x8] sm:$0xff] (!%p141_p9)  ;;  %v171_v26 = vld [vmem:[%s814_s1 + $0x10] sm:$0xff] (!%p141_p9)  ;;  %s743_s27 = scalar_lea.vmem (!%p141_p9), [#allocation2], %s467_s26  ;;  %s762_s4 = scalar_lea.hbm (!%p141_p9), %s816_s3, %s484_s28 }
  0x11   : > { %v174_v25 = vld [vmem:[%s814_s1 + $0x28] sm:$0xff] (!%p141_p9)  ;;  %v175_v27 = vld [vmem:[%s814_s1 + $0x30] sm:$0xff] (!%p141_p9)  ;;  %v172_v28 = vld [vmem:[%s814_s1 + $0x18] sm:$0xff] (!%p141_p9)  ;;  %s772_s5 = scalar_lea.sflag (!%p141_p9), [#allocation3], %s161_s25 }
  0x12   : > { %v176_v29 = vld [vmem:[%s814_s1 + $0x38] sm:$0xff] (!%p141_p9) }
  0x14   : > { %210 = vperm.xlu1 (!%p141_p9), %541, %v188_v4   ;;  %200 = vperm.xlu0 (!%p141_p9), %540, %v186_v5  }
  0x15   : > { %s165_s24 = scalar_select %p164_p10, %s652_s16, 1 }
  0x17   : > { %s483_s29 = sshll.u32 %s165_s24, 6 }
  0x18   : > { %s168_s7 = scalar_lea.vmem %s813_s0, %s483_s29  ;;  %220 = vperm.xlu1 %541, %v190_v17   ;;  %215 = vperm.xlu0 %540, %v189_v18   ;;  %s401_s29 = sshll.u32 %s743_s27, 4  ;;  %s764_s29 = int_to_ptr.vmem [resolvable:$true] %s401_s29 }
  0x19   : > { %v178_v6 = vld [vmem:[%s168_s7 + $0x8] sm:$0xff]  ;;  %v180_v7 = vld [vmem:[%s168_s7 + $0x18] sm:$0xff]  ;;  %v177_v8 = vld [vmem:[%s168_s7] sm:$0xff]  ;;  %s542_s6 = scalar_lea.vmem %s764_s29, 2048 }
  0x1a   : > { %v485_v9 = vpack.c.bf16 %v180_v7, %v178_v6  ;;  %v179_v10 = vld [vmem:[%s168_s7 + $0x10] sm:$0xff]  ;;  %v182_v11 = vld [vmem:[%s168_s7 + $0x28] sm:$0xff]  ;;  %v184_v12 = vld [vmem:[%s168_s7 + $0x38] sm:$0xff]  ;;  %p543_p11 = scmp.ne.s32.totalorder %s764_s29, %s542_s6 }
  0x1b   : > { %v487_v13 = vpack.c.bf16 %v179_v10, %v177_v8  ;;  %v489_v14 = vpack.c.bf16 %v184_v12, %v182_v11  ;;  %v181_v15 = vld [vmem:[%s168_s7 + $0x20] sm:$0xff]  ;;  %v183_v16 = vld [vmem:[%s168_s7 + $0x30] sm:$0xff]  ;;  %s608_s7 = smov [#allocation2]  }
  0x1c   : > { %486 = vmatprep.subr.bf16.mxu0 %v485_v9  ;;  %493 = vmatprep.subr.bf16.mxu1 %v485_v9  ;;  %v491_v19 = vpack.c.bf16 %v183_v16, %v181_v15  ;;  %p544_p12 = pnand %p543_p11, %p669_p5  ;;  %s546_s8 = sshll.u32 %s608_s7, 4  ;;  %s547_s8 = int_to_ptr.vmem [resolvable:$false] %s546_s8 }
  0x1d   : > { %488 = vmatpush1.bf16.msra.mxu0 %v487_v13  ;;  %495 = vmatpush1.bf16.msra.mxu1 %v487_v13  ;;  %s548_s9 = scalar_lea.vmem %s547_s8, 4096  ;;  %p549_p0 = scmp.lt.s32.totalorder %s764_s29, %s547_s8 }
  0x1e   : > { %490 = vmatprep.subr.bf16.mxu0 %v489_v14  ;;  %494 = vmatprep.subr.bf16.mxu1 %v489_v14  ;;  %p545_p13 = pneg %p544_p12  ;;  %p550_p1 = scmp.lt.s32.totalorder %s548_s9, %s542_s6 }
  0x1f   : > { %230 = vperm.xlu1 %541, %v192_v20   ;;  %225 = vperm.xlu0 %540, %v191_v21  }
  0x20   : > { %p551_p2 = por %p550_p1, %p549_p0 }
  0x21   : > { %492 = vmatpush1.bf16.msra.mxu0 %v491_v19  ;;  %496 = vmatpush1.bf16.msra.mxu1 %v491_v19 }
  0x22   : > { %p552_p3 = pnand %p551_p2, %p545_p13 }
  0x24   : > { %470 = vmatmul.mubr.msk.f32.vlgmr.msra.gmra.mrb[0].mxu0 %vm233_vm0, %v169_v22  ;;  %474 = vmatmul.mubr.msk.f32.vlgmr.msra.gmra.mrb[0].mxu1 %vm233_vm0, %v173_v23 }
  0x25   : > { %328 = vmatprep.mubr.f32.mxu0 %v606_v0  ;;  %352 = vmatprep.mubr.f32.mxu1 %v606_v0 }
  0x28   : > { %471 = vmatmul.mubr.msk.f32.gmra.mrb[2].mxu0 %vm233_vm0, %v170_v24  ;;  %475 = vmatmul.mubr.msk.f32.gmra.mrb[2].mxu1 %vm233_vm0, %v174_v25 }
  0x29   : > { %334 = vmatprep.mubr.f32.mxu0 %v606_v0  ;;  %358 = vmatprep.mubr.f32.mxu1 %v606_v0 }
  0x2c   : > { %472 = vmatmul.mubr.msk.f32.gmra.mrb[4].mxu0 %vm233_vm0, %v171_v26  ;;  %476 = vmatmul.mubr.msk.f32.gmra.mrb[4].mxu1 %vm233_vm0, %v175_v27 }
  0x2d   : > { %340 = vmatprep.mubr.f32.mxu0 %v606_v0  ;;  %364 = vmatprep.mubr.f32.mxu1 %v606_v0 }
  0x30   : > { %473 = vmatmul.mubr.msk.f32.gmra.mrb[6].mxu0 %vm233_vm0, %v172_v28  ;;  %477 = vmatmul.mubr.msk.f32.gmra.mrb[6].mxu1 %vm233_vm0, %v176_v29 }
  0x8f   : > { %v196_v30 = vpop.permute.xlu0 %195  ;;  %v206_v31 = vpop.permute.xlu1 %205 }
  0x93   : > { %v201_v32 = vpop.permute.xlu0 %200  ;;  %v211_v33 = vpop.permute.xlu1 %210 }
  0x97   : > { %v216_v34 = vpop.permute.xlu0 %215  ;;  %v221_v43 = vpop.permute.xlu1 %220 }
  0x9e   : > { %v226_v52 = vpop.permute.xlu0 %225  ;;  %v231_v61 = vpop.permute.xlu1 %230 }
  0xf7   : > { %v324_v35 = vpop.f32.mrb[0].mxu0  ;;  %v348_v36 = vpop.f32.mrb[0].mxu1 }
  0xf8   : > { %v325_v37 = vadd.f32 %v324_v35, %v196_v30  ;;  %v349_v38 = vadd.f32 %v348_v36, %v216_v34  ;;  %v326_v39 = vpop.f32.mrb[1].mxu0  ;;  %v350_v40 = vpop.f32.mrb[1].mxu1 }
  0xf9   : > { %v327_v41 = vadd.f32 %v326_v39, %v196_v30  ;;  %v351_v42 = vadd.f32 %v350_v40, %v216_v34 }
  0xfa   : > { %371 = vst [vmem:[%s743_s27] sm:$0xff] %v325_v37  ;;  %379 = vst [vmem:[%s743_s27 + $0x40] sm:$0xff] %v349_v38 }
  0xfb   : > { %372 = vst [vmem:[%s743_s27 + $0x8] sm:$0xff] %v327_v41  ;;  %380 = vst [vmem:[%s743_s27 + $0x48] sm:$0xff] %v351_v42  ;;  %v330_v44 = vpop.f32.mrb[2].mxu0  ;;  %v354_v45 = vpop.f32.mrb[2].mxu1 }
  0xfc   : > { %v331_v46 = vadd.f32 %v330_v44, %v201_v32  ;;  %v355_v47 = vadd.f32 %v354_v45, %v221_v43  ;;  %v332_v48 = vpop.f32.mrb[3].mxu0  ;;  %v356_v49 = vpop.f32.mrb[3].mxu1 }
  0xfd   : > { %v333_v50 = vadd.f32 %v332_v48, %v201_v32  ;;  %v357_v51 = vadd.f32 %v356_v49, %v221_v43 }
  0xfe   : > { %373 = vst [vmem:[%s743_s27 + $0x10] sm:$0xff] %v331_v46  ;;  %381 = vst [vmem:[%s743_s27 + $0x50] sm:$0xff] %v355_v47 }
  0xff   : > { %374 = vst [vmem:[%s743_s27 + $0x18] sm:$0xff] %v333_v50  ;;  %382 = vst [vmem:[%s743_s27 + $0x58] sm:$0xff] %v357_v51  ;;  %v336_v53 = vpop.f32.mrb[4].mxu0  ;;  %v360_v54 = vpop.f32.mrb[4].mxu1 }
 0x100   : > { %v337_v55 = vadd.f32 %v336_v53, %v206_v31  ;;  %v361_v56 = vadd.f32 %v360_v54, %v226_v52  ;;  %v338_v57 = vpop.f32.mrb[5].mxu0  ;;  %v362_v58 = vpop.f32.mrb[5].mxu1 }
 0x101   : > { %v339_v59 = vadd.f32 %v338_v57, %v206_v31  ;;  %v363_v60 = vadd.f32 %v362_v58, %v226_v52 }
 0x102   : > { %375 = vst [vmem:[%s743_s27 + $0x20] sm:$0xff] %v337_v55  ;;  %383 = vst [vmem:[%s743_s27 + $0x60] sm:$0xff] %v361_v56 }
 0x103   : > { %376 = vst [vmem:[%s743_s27 + $0x28] sm:$0xff] %v339_v59  ;;  %384 = vst [vmem:[%s743_s27 + $0x68] sm:$0xff] %v363_v60  ;;  %v342_v62 = vpop.f32.mrb[6].mxu0  ;;  %v366_v63 = vpop.f32.mrb[6].mxu1 }
 0x104   : > { %v343_v0 = vadd.f32 %v342_v62, %v211_v33  ;;  %v367_v1 = vadd.f32 %v366_v63, %v231_v61  ;;  %v344_v2 = vpop.f32.mrb[7].mxu0  ;;  %v368_v3 = vpop.f32.mrb[7].mxu1 }
 0x105   : > { %v345_v4 = vadd.f32 %v344_v2, %v211_v33  ;;  %v369_v5 = vadd.f32 %v368_v3, %v231_v61 }
 0x106   : > { %377 = vst [vmem:[%s743_s27 + $0x30] sm:$0xff] %v343_v0  ;;  %385 = vst [vmem:[%s743_s27 + $0x70] sm:$0xff] %v367_v1 }
 0x107   : > { %378 = vst [vmem:[%s743_s27 + $0x38] sm:$0xff] %v345_v4  ;;  %386 = vst [vmem:[%s743_s27 + $0x78] sm:$0xff] %v369_v5 }
 0x108   : > { %555 = shalt.err (!%p552_p3)
}
 0x109   : > { %s556_s10 = scalar_lea.hbm %s762_s4, 2048  ;;  %s560_s19 = scalar_lea.hbm %s816_s3, 4096 }
 0x10a   : > { %p557_p4 = scmp.ne.s32.totalorder %s762_s4, %s556_s10  ;;  %p561_p9 = scmp.lt.u32.totalorder %s762_s4, %s816_s3 }
 0x10b   : > { %p562_p10 = scmp.lt.u32.totalorder %s560_s19, %s556_s10  ;;  %p564_p12 = scmp.lt.u32.totalorder %s556_s10, %s762_s4 }
 0x10c   : > { %p558_p7 = pnand %p557_p4, %p669_p5 }
 0x10d   : > { %p563_p11 = por %p562_p10, %p561_p9 }
 0x10e   : > { %p559_p8 = pneg %p558_p7 }
 0x10f   : > { %p565_p13 = por %p564_p12, %p563_p11 }
 0x111   : > { %p566_p0 = pnand %p565_p13, %p559_p8 }
 0x113   : > { %569 = shalt.err (!%p566_p0)
}
 0x114   : > { %s609_s25 = smov 256   ;;  %s610_s26 = smov 16  }
 0x115   : > { %497 = dma.vmem_to_hbm [thread:$0]  (%p669_p5), %s764_s29, 2048, %s762_s4, %s772_s5, %s609_s25, %s609_s25, %s610_s26  }
 0x116 PF: > { %p503_p1 = scmp.ge.s32.totalorder %s604_s15, 2  ;;  %s416_s27 = sand.u32 1, %s592_s12  }
 0x117   : > { %s417_s28 = scalar_lea.sflag [#allocation3], %s416_s27 }
 0x118   : > { %p500_p2 = pnand %p503_p1, %p673_p6 }
 0x11a   : > { %587 = dma.done.wait (!%p500_p2), %s417_s28, 2048  }
 0x11b   : > { %589 = vsyncadd (!%p500_p2), %s417_s28, 4294965248  ;;  %p13_p3 = scmp.ge.s32.totalorder %s656_s18, 4   ;;  %s819_s12 = smov %s596_s13 }
 0x11c   : > { %s820_s13 = smov %s600_s14  ;;  %s821_s14 = smov %s667_s21 }
 0x11d   : > { %s822_s15 = smov %s656_s18  ;;  %15 = sbr.rel (!%p13_p3) target bundleno = 3 (0x3), region = 67 }
 0x124   :  { %422 = vsyncpa [#allocation3], 1 }
 0x125   :  { %424 = vsyncpa [#allocation3 + $0x1], 1 }

</bundles_post_ra>
